<compile_context>
chip_gen: v7x
topology: tpu7x:2x2x1
jax: 0.10.0
libtpu: 0.0.40
codegen_flags: <defaults>
</compile_context>

<pallas_src>
import jax
import jax.numpy as jnp
from jax.experimental import pallas as pl
from jax.experimental.pallas import tpu as pltpu

IN_FEATURES = 4
OUT_FEATURES = 3
PACK = 128 // IN_FEATURES            # 32 examples per packed row
X_LANES = PACK * IN_FEATURES         # 128 (lane-dense input rows)
O_LANES = PACK * OUT_FEATURES        # 96  (output rows, full minor dim)


def _round_up(x, m):
    return ((x + m - 1) // m) * m


def _packed_linear_kernel(x_ref, w_ref, b_ref, o_ref):
    """One grid step: (TR, 128) @ (128, 96) + bias -> (TR, 96).

    x_ref: packed inputs, 32 examples x 4 interleaved features per row (VMEM).
    w_ref: kron(I_32, w.T) block-diagonal weights, (128, 96) (VMEM, resident).
    b_ref: bias tiled 32x, (1, 96) (VMEM, resident).
    o_ref: packed outputs, 32 examples x 3 interleaved logits per row (VMEM).
    """
    acc = jnp.dot(x_ref[...], w_ref[...],
                  preferred_element_type=jnp.float32,
                  precision=jax.lax.Precision.HIGHEST)
    o_ref[...] = (acc + b_ref[...]).astype(o_ref.dtype)


def softmax_model_forward(x, w, b, *, tr_max=8192):
    """Linear(4, 3) forward: out = x @ w.T + b (PyTorch nn.Linear semantics).

    x: (B, 4) f32;  w: (3, 4) f32 (PyTorch (out, in) layout);  b: (3,) f32.
    """
    B, n_in = x.shape
    n_out = w.shape[0]
    assert n_in == IN_FEATURES and n_out == OUT_FEATURES
    assert tr_max % 8 == 0

    # Batch tiling in units of packed rows (32 examples / row).
    rows_needed = pl.cdiv(B, PACK)
    tr = min(tr_max, _round_up(rows_needed, 8))
    rows = _round_up(rows_needed, tr)
    bp = rows * PACK

    # Zero-pad the batch (padded examples produce bias-only logits, sliced off
    # below), then contiguous (free) reshape to the packed lane-dense layout.
    if bp != B:
        x = jnp.pad(x, ((0, bp - B), (0, 0)))
    x_packed = x.reshape(rows, X_LANES)                                   # (rows, 128)

    # Block-diagonal weights / tiled bias: one MXU matmul performs the lane
    # de-interleave, the (4 -> 3) contraction, and the output re-interleave.
    w_big = jnp.kron(jnp.eye(PACK, dtype=x.dtype), w.T.astype(x.dtype))   # (128, 96)
    b_big = jnp.tile(b.astype(x.dtype), PACK).reshape(1, O_LANES)         # (1, 96)

    out_packed = pl.pallas_call(
        _packed_linear_kernel,
        out_shape=jax.ShapeDtypeStruct((rows, O_LANES), x.dtype),
        grid=(rows // tr,),
        in_specs=[
            pl.BlockSpec((tr, X_LANES), lambda i: (i, 0)),         # packed x tile
            pl.BlockSpec((X_LANES, O_LANES), lambda i: (0, 0)),    # weights (resident)
            pl.BlockSpec((1, O_LANES), lambda i: (0, 0)),          # bias (resident)
        ],
        out_specs=pl.BlockSpec((tr, O_LANES), lambda i: (i, 0)),   # packed out tile
        compiler_params=pltpu.CompilerParams(
            dimension_semantics=("parallel",),
            vmem_limit_bytes=32 * 1024 * 1024),
        cost_estimate=pl.CostEstimate(
            flops=2 * B * IN_FEATURES * OUT_FEATURES,
            bytes_accessed=4 * B * (IN_FEATURES + OUT_FEATURES),
            transcendentals=0),
    )(x_packed, w_big, b_big)

    # Free contiguous reshape back to row-major logits; slice off batch padding.
    return out_packed.reshape(bp, OUT_FEATURES)[:B]


if __name__ == "__main__":
    key = jax.random.PRNGKey(0)
    k_x, k_w, k_b, k_x2 = jax.random.split(key, 4)

    batch, in_features, out_features = 8, IN_FEATURES, OUT_FEATURES

    # PyTorch nn.Linear default init: U(-1/sqrt(in), 1/sqrt(in)), weight (out, in).
    bound = 1.0 / (in_features ** 0.5)
    w = jax.random.uniform(
        k_w, (out_features, in_features), jnp.float32, -bound, bound)
    b = jax.random.uniform(k_b, (out_features,), jnp.float32, -bound, bound)

    def exact_ref(xv):
        # Exact f32 reference via broadcast-multiply + sum (no matmul-precision
        # ambiguity on the reference side).
        return (xv[:, None, :] * w[None, :, :]).sum(-1) + b

    fwd = jax.jit(softmax_model_forward, static_argnames=("tr_max",))

    # Small batch: single grid step, batch padded 8 -> 256 (pad sliced off).
    x = jax.random.normal(k_x, (batch, in_features), jnp.float32)
    out = jax.block_until_ready(fwd(x, w, b))
    assert out.shape == (batch, out_features)
    assert jnp.allclose(out, exact_ref(x), atol=1e-5, rtol=1e-5)

    # Larger, non-32-aligned batch with a small tile to exercise padding and a
    # multi-step ("parallel") grid.
    big_batch = 2500
    x2 = jax.random.normal(k_x2, (big_batch, in_features), jnp.float32)
    out2 = jax.block_until_ready(fwd(x2, w, b, tr_max=16))
    assert out2.shape == (big_batch, out_features)
    assert jnp.allclose(out2, exact_ref(x2), atol=1e-5, rtol=1e-5)

    print("KERNEL_OK")
</pallas_src>

<mosaic_0001>
module attributes {stable_mosaic.version = 11 : i64} {
  func.func @_packed_linear_kernel(%arg0: i32, %arg1: memref<8x128xf32, #tpu.memory_space<vmem>>, %arg2: memref<128x96xf32, #tpu.memory_space<vmem>>, %arg3: memref<1x96xf32, #tpu.memory_space<vmem>>, %arg4: memref<8x96xf32, #tpu.memory_space<vmem>>) attributes {dimension_semantics = [#tpu.dimension_semantics<parallel>], iteration_bounds = array<i64: 1>, scalar_prefetch = 0 : i64, scratch_operands = 0 : i64, tpu.core_type = #tpu.core_type<tc>, window_params = [{transform_indices = @transform_0, window_bounds = array<i64: 8, 128>}, {pipeline_mode = #tpu.pipeline_mode<synchronous>, transform_indices = @transform_1, window_bounds = array<i64: 128, 96>}, {pipeline_mode = #tpu.pipeline_mode<synchronous>, transform_indices = @transform_2, window_bounds = array<i64: 1, 96>}, {transform_indices = @transform_3, window_bounds = array<i64: 8, 96>}]} {
    %c0 = arith.constant 0 : index
    %c0_0 = arith.constant 0 : index
    %0 = vector.load %arg1[%c0, %c0_0] : memref<8x128xf32, #tpu.memory_space<vmem>>, vector<8x128xf32>
    %c0_1 = arith.constant 0 : index
    %c0_2 = arith.constant 0 : index
    %1 = vector.load %arg2[%c0_1, %c0_2] : memref<128x96xf32, #tpu.memory_space<vmem>>, vector<128x96xf32>
    %cst = arith.constant dense<0.000000e+00> : vector<8x96xf32>
    %2 = tpu.matmul %0, %1, %cst {dimension_numbers = #tpu.dot_dimension_numbers<[1], [0], [0], [1], [0, 0, 1, 1], [], []>, precision = #tpu.contract_precision<fp32>} : vector<8x128xf32>, vector<128x96xf32>, vector<8x96xf32> -> vector<8x96xf32>
    %c0_3 = arith.constant 0 : index
    %c0_4 = arith.constant 0 : index
    %3 = vector.load %arg3[%c0_3, %c0_4] : memref<1x96xf32, #tpu.memory_space<vmem>>, vector<1x96xf32>
    %4 = vector.broadcast %3 : vector<1x96xf32> to vector<8x96xf32>
    %5 = arith.addf %2, %4 : vector<8x96xf32>
    %c0_5 = arith.constant 0 : index
    %c0_6 = arith.constant 0 : index
    %6 = vector.load %arg4[%c0_5, %c0_6] : memref<8x96xf32, #tpu.memory_space<vmem>>, vector<8x96xf32>
    tpu.vector_store %arg4[%c0_5, %c0_6], %5 {strides = array<i32>} : memref<8x96xf32, #tpu.memory_space<vmem>>, vector<8x96xf32>,
    return
  }
  func.func @transform_0(%arg0: i32) -> (i32, i32) {
    %c0_i32 = arith.constant 0 : i32
    %c0_i32_0 = arith.constant 0 : i32
    return %arg0, %c0_i32 : i32, i32
  }
  func.func @transform_1(%arg0: i32) -> (i32, i32) {
    %c0_i32 = arith.constant 0 : i32
    %c0_i32_0 = arith.constant 0 : i32
    %c0_i32_1 = arith.constant 0 : i32
    return %c0_i32, %c0_i32_0 : i32, i32
  }
  func.func @transform_2(%arg0: i32) -> (i32, i32) {
    %c0_i32 = arith.constant 0 : i32
    %c0_i32_0 = arith.constant 0 : i32
    %c0_i32_1 = arith.constant 0 : i32
    return %c0_i32, %c0_i32_0 : i32, i32
  }
  func.func @transform_3(%arg0: i32) -> (i32, i32) {
    %c0_i32 = arith.constant 0 : i32
    %c0_i32_0 = arith.constant 0 : i32
    return %arg0, %c0_i32 : i32, i32
  }
}

</mosaic_0001>

<bundles_post_ra>
// kernel: tile.8
= control target key start
LH: loop header
LB: loop body
LE: loop exit
PB: predicated region body
PF: predicated region fallthrough
CT: control target
= control target key end

     0   :  { %s40_s0 = inlined_call_operand.vmem [shape: f32[3], index: 0, kind: input, shape index: {}]   ;;  %s41_s1 = inlined_call_operand.vmem [shape: f32[32,3], index: 1, kind: output, shape index: {}]  }
   0x1   :  { %v4_v0 = vld [vmem:[%s40_s0] ss:$0 sm:$0xff] }
   0x2   :  { %5 = vst [vmem:[%s41_s1] sm:$0xff] %v4_v0  ;;  %12 = vst [vmem:[%s41_s1 + $0x8] sm:$0xff] %v4_v0 }
   0x3   :  { %13 = vst [vmem:[%s41_s1 + $0x10] sm:$0xff] %v4_v0  ;;  %14 = vst [vmem:[%s41_s1 + $0x18] sm:$0xff] %v4_v0 }

// kernel: tile.9
= control target key start
LH: loop header
LB: loop body
LE: loop exit
PB: predicated region body
PF: predicated region fallthrough
CT: control target
= control target key end

     0   :  { %s259_s10 = smov 93   ;;  %s260_s11 = smov 87   ;;  %vm3_vm0 = vcmask 23552   ;;  %vm9_vm1 = vcmask 786152   ;;  %vm15_vm2 = vcmask 761552   ;;  %vm21_vm3 = vcmask 736952   ;;  %s399_s0 = inlined_call_operand.vmem [shape: f32[32,3], index: 0, kind: input, shape index: {}]   ;;  %s400_s1 = inlined_call_operand.vmem [shape: f32[1,96], index: 1, kind: output, shape index: {}]  }
   0x1   :  { %v197_v0 = vld [vmem:[%s399_s0 + $0x1f] sm:$0x1]   ;;  %v199_v1 = vld [vmem:[%s399_s0 + $0x1d] sm:$0x1]   ;;  %v198_v2 = vld [vmem:[%s399_s0 + $0x1e] sm:$0x1]  }
   0x2   :  { %7 = vrot.lane.b32.xlu0 %v197_v0, %s259_s10  ;;  %19 = vrot.lane.b32.xlu1 %v199_v1, %s260_s11  ;;  %v200_v3 = vld [vmem:[%s399_s0 + $0x1c] sm:$0x1]   ;;  %s261_s16 = smov 90   ;;  %s262_s17 = smov 84   ;;  %v201_v4 = vld [vmem:[%s399_s0 + $0x1b] sm:$0x1]  }
   0x3   :  { %v202_v5 = vld [vmem:[%s399_s0 + $0x1a] sm:$0x1]   ;;  %s263_s22 = smov 81   ;;  %s264_s23 = smov 78   ;;  %v203_v6 = vld [vmem:[%s399_s0 + $0x19] sm:$0x1]  }
   0x4   :  { %v204_v7 = vld [vmem:[%s399_s0 + $0x18] sm:$0x1]   ;;  %s265_s28 = smov 75   ;;  %s266_s29 = smov 72   ;;  %v205_v8 = vld [vmem:[%s399_s0 + $0x17] sm:$0x1]  }
   0x5   :  { %v206_v9 = vld [vmem:[%s399_s0 + $0x16] sm:$0x1]   ;;  %v2_v10 = vld [vmem:[%s399_s0] sm:$0x1]   ;;  %s267_s7 = smov 69   ;;  %s268_s8 = smov 66  }
   0x6   :  { %13 = vrot.lane.b32.xlu0 %v198_v2, %s261_s16  ;;  %25 = vrot.lane.b32.xlu1 %v200_v3, %s262_s17  ;;  %4 = vst.msk [vmem:[#allocation0] sm:$0x1] %vm3_vm0, %v2_v10   ;;  %v207_v11 = vld [vmem:[%s399_s0 + $0x15] sm:$0x1]   ;;  %v208_v12 = vld [vmem:[%s399_s0 + $0x14] sm:$0x1]  }
   0x7   :  { %s269_s13 = smov 63   ;;  %s270_s14 = smov 60   ;;  %v209_v13 = vld [vmem:[%s399_s0 + $0x13] sm:$0x1]   ;;  %v210_v14 = vld [vmem:[%s399_s0 + $0x12] sm:$0x1]  }
   0x8   :  { %s271_s19 = smov 57   ;;  %s272_s20 = smov 54   ;;  %v211_v15 = vld [vmem:[%s399_s0 + $0x11] sm:$0x1]   ;;  %v212_v16 = vld [vmem:[%s399_s0 + $0x10] sm:$0x1]  }
   0x9   :  { %s273_s25 = smov 51   ;;  %s274_s26 = smov 48   ;;  %v213_v17 = vld [vmem:[%s399_s0 + $0xf] sm:$0x1]   ;;  %v214_v18 = vld [vmem:[%s399_s0 + $0xe] sm:$0x1]  }
   0xa   :  { %31 = vrot.lane.b32.xlu0 %v201_v4, %s263_s22  ;;  %37 = vrot.lane.b32.xlu1 %v202_v5, %s264_s23  ;;  %s275_s2 = smov 45   ;;  %s276_s3 = smov 42   ;;  %v215_v19 = vld [vmem:[%s399_s0 + $0xd] sm:$0x1]   ;;  %v216_v20 = vld [vmem:[%s399_s0 + $0xc] sm:$0x1]  }
   0xb   :  { %s278_s9 = smov 36   ;;  %v217_v21 = vld [vmem:[%s399_s0 + $0xb] sm:$0x1]   ;;  %v218_v22 = vld [vmem:[%s399_s0 + $0xa] sm:$0x1]   ;;  %s280_s15 = smov 30  }
   0xc   :  { %v219_v23 = vld [vmem:[%s399_s0 + $0x9] sm:$0x1]   ;;  %v220_v24 = vld [vmem:[%s399_s0 + $0x8] sm:$0x1]   ;;  %s282_s21 = smov 24   ;;  %s284_s27 = smov 18  }
   0xd   :  { %v221_v25 = vld [vmem:[%s399_s0 + $0x7] sm:$0x1]   ;;  %v222_v26 = vld [vmem:[%s399_s0 + $0x6] sm:$0x1]   ;;  %v223_v27 = vld [vmem:[%s399_s0 + $0x5] sm:$0x1]  }
   0xe   :  { %43 = vrot.lane.b32.xlu0 %v203_v6, %s265_s28  ;;  %49 = vrot.lane.b32.xlu1 %v204_v7, %s266_s29  ;;  %v224_v28 = vld [vmem:[%s399_s0 + $0x4] sm:$0x1]   ;;  %s286_s4 = smov 12   ;;  %v225_v29 = vld [vmem:[%s399_s0 + $0x3] sm:$0x1]   ;;  %s288_s10 = smov 6  }
   0xf   :  { %v226_v30 = vld [vmem:[%s399_s0 + $0x2] sm:$0x1]   ;;  %v227_v31 = vld [vmem:[%s399_s0 + $0x1] sm:$0x1]   ;;  %s289_s0 = smov 3   ;;  %vm27_vm4 = vcmask 712352  }
  0x10   :  { %vm33_vm5 = vcmask 687752   ;;  %vm39_vm6 = vcmask 663152   ;;  %vm45_vm7 = vcmask 638552   ;;  %vm51_vm8 = vcmask 613952  }
  0x11   :  { %vm57_vm9 = vcmask 589352   ;;  %vm63_vm10 = vcmask 564752   ;;  %vm69_vm11 = vcmask 540152   ;;  %vm75_vm12 = vcmask 515552  }
  0x12   :  { %55 = vrot.lane.b32.xlu0 %v205_v8, %s267_s7  ;;  %61 = vrot.lane.b32.xlu1 %v206_v9, %s268_s8  ;;  %s277_s8 = smov 39   ;;  %vm81_vm13 = vcmask 490952   ;;  %vm87_vm14 = vcmask 466352   ;;  %vm93_vm15 = vcmask 441752   ;;  %vm99_vm0 = vcmask 417152  }
  0x16   :  { %67 = vrot.lane.b32.xlu0 %v207_v11, %s269_s13  ;;  %73 = vrot.lane.b32.xlu1 %v208_v12, %s270_s14  ;;  %s279_s14 = smov 33  }
  0x1a   :  { %79 = vrot.lane.b32.xlu0 %v209_v13, %s271_s19  ;;  %85 = vrot.lane.b32.xlu1 %v210_v14, %s272_s20  ;;  %s281_s20 = smov 27  }
  0x1e   :  { %91 = vrot.lane.b32.xlu0 %v211_v15, %s273_s25  ;;  %97 = vrot.lane.b32.xlu1 %v212_v16, %s274_s26  ;;  %s283_s26 = smov 21  }
  0x22   :  { %103 = vrot.lane.b32.xlu0 %v213_v17, %s275_s2  ;;  %109 = vrot.lane.b32.xlu1 %v214_v18, %s276_s3  ;;  %s285_s3 = smov 15  }
  0x26   :  { %115 = vrot.lane.b32.xlu0 %v215_v19, %s277_s8  ;;  %121 = vrot.lane.b32.xlu1 %v216_v20, %s278_s9  ;;  %s287_s9 = smov 9  }
  0x2a   :  { %127 = vrot.lane.b32.xlu0 %v217_v21, %s279_s14  ;;  %133 = vrot.lane.b32.xlu1 %v218_v22, %s280_s15 }
  0x2e   :  { %139 = vrot.lane.b32.xlu0 %v219_v23, %s281_s20  ;;  %145 = vrot.lane.b32.xlu1 %v220_v24, %s282_s21 }
  0x32   :  { %151 = vrot.lane.b32.xlu0 %v221_v25, %s283_s26  ;;  %157 = vrot.lane.b32.xlu1 %v222_v26, %s284_s27 }
  0x36   :  { %163 = vrot.lane.b32.xlu0 %v223_v27, %s285_s3  ;;  %169 = vrot.lane.b32.xlu1 %v224_v28, %s286_s4 }
  0x3a   :  { %175 = vrot.lane.b32.xlu0 %v225_v29, %s287_s9  ;;  %181 = vrot.lane.b32.xlu1 %v226_v30, %s288_s10 }
  0x3e   :  { %187 = vrot.lane.b32.xlu0 %v227_v31, %s289_s0 }
  0x74   :  { %v8_v32 = vpop.permute.xlu0 %7   ;;  %v20_v33 = vpop.permute.xlu1 %19  }
  0x75   :  { %10 = vst.msk [vmem:[#allocation0] sm:$0x1] %vm9_vm1, %v8_v32   ;;  %vm105_vm1 = vcmask 392552  }
  0x78   :  { %v14_v34 = vpop.permute.xlu0 %13   ;;  %v26_v35 = vpop.permute.xlu1 %25  }
  0x79   :  { %16 = vst.msk [vmem:[#allocation0] sm:$0x1] %vm15_vm2, %v14_v34   ;;  %vm111_vm2 = vcmask 367952  }
  0x7a   :  { %22 = vst.msk [vmem:[#allocation0] sm:$0x1] %vm21_vm3, %v20_v33   ;;  %vm117_vm3 = vcmask 343352  }
  0x7b   :  { %28 = vst.msk [vmem:[#allocation0] sm:$0x1] %vm27_vm4, %v26_v35   ;;  %vm123_vm4 = vcmask 318752  }
  0x7c   :  { %v32_v36 = vpop.permute.xlu0 %31   ;;  %v38_v37 = vpop.permute.xlu1 %37  }
  0x7d   :  { %34 = vst.msk [vmem:[#allocation0] sm:$0x1] %vm33_vm5, %v32_v36   ;;  %vm129_vm5 = vcmask 294152  }
  0x7e   :  { %40 = vst.msk [vmem:[#allocation0] sm:$0x1] %vm39_vm6, %v38_v37   ;;  %vm135_vm6 = vcmask 269552  }
  0x80   :  { %v44_v38 = vpop.permute.xlu0 %43   ;;  %v50_v39 = vpop.permute.xlu1 %49  }
  0x81   :  { %46 = vst.msk [vmem:[#allocation0] sm:$0x1] %vm45_vm7, %v44_v38   ;;  %vm141_vm7 = vcmask 244952  }
  0x82   :  { %52 = vst.msk [vmem:[#allocation0] sm:$0x1] %vm51_vm8, %v50_v39   ;;  %vm147_vm8 = vcmask 220352  }
  0x84   :  { %v56_v40 = vpop.permute.xlu0 %55   ;;  %v62_v41 = vpop.permute.xlu1 %61  }
  0x85   :  { %58 = vst.msk [vmem:[#allocation0] sm:$0x1] %vm57_vm9, %v56_v40   ;;  %vm153_vm9 = vcmask 195752  }
  0x86   :  { %64 = vst.msk [vmem:[#allocation0] sm:$0x1] %vm63_vm10, %v62_v41   ;;  %vm159_vm10 = vcmask 171152  }
  0x88   :  { %v68_v42 = vpop.permute.xlu0 %67   ;;  %v74_v43 = vpop.permute.xlu1 %73  }
  0x89   :  { %70 = vst.msk [vmem:[#allocation0] sm:$0x1] %vm69_vm11, %v68_v42   ;;  %vm165_vm11 = vcmask 146552  }
  0x8a   :  { %76 = vst.msk [vmem:[#allocation0] sm:$0x1] %vm75_vm12, %v74_v43   ;;  %vm171_vm12 = vcmask 121952  }
  0x8c   :  { %v80_v44 = vpop.permute.xlu0 %79   ;;  %v86_v45 = vpop.permute.xlu1 %85  }
  0x8d   :  { %82 = vst.msk [vmem:[#allocation0] sm:$0x1] %vm81_vm13, %v80_v44   ;;  %vm177_vm13 = vcmask 97352  }
  0x8e   :  { %88 = vst.msk [vmem:[#allocation0] sm:$0x1] %vm87_vm14, %v86_v45   ;;  %vm183_vm14 = vcmask 72752  }
  0x90   :  { %v92_v46 = vpop.permute.xlu0 %91   ;;  %v98_v47 = vpop.permute.xlu1 %97  }
  0x91   :  { %94 = vst.msk [vmem:[#allocation0] sm:$0x1] %vm93_vm15, %v92_v46   ;;  %vm189_vm15 = vcmask 48152  }
  0x92   :  { %100 = vst.msk [vmem:[#allocation0] sm:$0x1] %vm99_vm0, %v98_v47  }
  0x94   :  { %v104_v48 = vpop.permute.xlu0 %103   ;;  %v110_v49 = vpop.permute.xlu1 %109  }
  0x95   :  { %106 = vst.msk [vmem:[#allocation0] sm:$0x1] %vm105_vm1, %v104_v48  }
  0x96   :  { %112 = vst.msk [vmem:[#allocation0] sm:$0x1] %vm111_vm2, %v110_v49  }
  0x98   :  { %v116_v50 = vpop.permute.xlu0 %115   ;;  %v122_v51 = vpop.permute.xlu1 %121  }
  0x99   :  { %118 = vst.msk [vmem:[#allocation0] sm:$0x1] %vm117_vm3, %v116_v50  }
  0x9a   :  { %124 = vst.msk [vmem:[#allocation0] sm:$0x1] %vm123_vm4, %v122_v51  }
  0x9c   :  { %v128_v52 = vpop.permute.xlu0 %127   ;;  %v134_v53 = vpop.permute.xlu1 %133  }
  0x9d   :  { %130 = vst.msk [vmem:[#allocation0] sm:$0x1] %vm129_vm5, %v128_v52  }
  0x9e   :  { %136 = vst.msk [vmem:[#allocation0] sm:$0x1] %vm135_vm6, %v134_v53  }
  0xa0   :  { %v140_v54 = vpop.permute.xlu0 %139   ;;  %v146_v55 = vpop.permute.xlu1 %145  }
  0xa1   :  { %142 = vst.msk [vmem:[#allocation0] sm:$0x1] %vm141_vm7, %v140_v54  }
  0xa2   :  { %148 = vst.msk [vmem:[#allocation0] sm:$0x1] %vm147_vm8, %v146_v55  }
  0xa4   :  { %v152_v56 = vpop.permute.xlu0 %151   ;;  %v158_v57 = vpop.permute.xlu1 %157  }
  0xa5   :  { %154 = vst.msk [vmem:[#allocation0] sm:$0x1] %vm153_vm9, %v152_v56  }
  0xa6   :  { %160 = vst.msk [vmem:[#allocation0] sm:$0x1] %vm159_vm10, %v158_v57  }
  0xa8   :  { %v164_v58 = vpop.permute.xlu0 %163   ;;  %v170_v59 = vpop.permute.xlu1 %169  }
  0xa9   :  { %166 = vst.msk [vmem:[#allocation0] sm:$0x1] %vm165_vm11, %v164_v58  }
  0xaa   :  { %172 = vst.msk [vmem:[#allocation0] sm:$0x1] %vm171_vm12, %v170_v59  }
  0xac   :  { %v176_v60 = vpop.permute.xlu0 %175   ;;  %v182_v61 = vpop.permute.xlu1 %181  }
  0xad   :  { %178 = vst.msk [vmem:[#allocation0] sm:$0x1] %vm177_vm13, %v176_v60  }
  0xae   :  { %184 = vst.msk [vmem:[#allocation0] sm:$0x1] %vm183_vm14, %v182_v61  }
  0xb0   :  { %v188_v62 = vpop.permute.xlu0 %187  }
  0xb1   :  { %190 = vst.msk [vmem:[#allocation0] sm:$0x1] %vm189_vm15, %v188_v62  }
  0xb8   :  { %v194_v63 = vld [vmem:[#allocation0] sm:$0x1] }
  0xb9   :  { %196 = vst [vmem:[%s400_s1] sm:$0x1] %v194_v63 }

// kernel: softmax_model_forward.1
= control target key start
LH: loop header
LB: loop body
LE: loop exit
PB: predicated region body
PF: predicated region fallthrough
CT: control target
= control target key end

     0   :  { %v1155_v0 = vmov 0.0|0.0   ;;  %vm1156_vm0 = vmmov 0   ;;  %v1157_v8 = vmov 0.0   ;;  %vm679_vm1 = vcmask 785408   ;;  %s1482_s1 = inlined_call_operand.vmem [shape: f32[128,96], index: 1, kind: input, shape index: {}]   ;;  %s1483_s0 = inlined_call_operand.vmem [shape: f32[8,128], index: 0, kind: input, shape index: {}]   ;;  %s1484_s2 = inlined_call_operand.vmem [shape: f32[1,96], index: 2, kind: input, shape index: {}]   ;;  %s1485_s3 = inlined_call_operand.vmem [shape: f32[8,96], index: 3, kind: output, shape index: {}]  }
   0x1   :  { %998 = vmatprep.subr.bf16.mxu1 %v1155_v0  ;;  %1070 = vmatprep.subr.bf16.mxu0 %v1155_v0  ;;  %v15_v1 = vld [vmem:[%s1482_s1] sm:$0xff]  ;;  %v16_v2 = vld [vmem:[%s1482_s1 + $0x8] sm:$0xff]  ;;  %v17_v3 = vld [vmem:[%s1482_s1 + $0x10] sm:$0xff] }
   0x2   :  { %v39_v4 = vand.u32 4294901760, %v15_v1  ;;  %v42_v5 = vand.u32 4294901760, %v16_v2  ;;  %v18_v6 = vld [vmem:[%s1482_s1 + $0x18] sm:$0xff]  ;;  %v45_v7 = vand.u32 4294901760, %v17_v3  ;;  %820 = vmatprep.mubr.msk.f32.mxu1 %vm1156_vm0, %v1157_v8  ;;  %925 = vmatprep.mubr.msk.f32.mxu0 %vm1156_vm0, %v1157_v8  ;;  %v19_v10 = vld [vmem:[%s1482_s1 + $0x20] sm:$0xff]  ;;  %v20_v11 = vld [vmem:[%s1482_s1 + $0x28] sm:$0xff] }
   0x3   :  { %v48_v9 = vand.u32 4294901760, %v18_v6  ;;  %v51_v14 = vand.u32 4294901760, %v19_v10  ;;  %v54_v15 = vand.u32 4294901760, %v20_v11  ;;  %v21_v16 = vld [vmem:[%s1482_s1 + $0x30] sm:$0xff]  ;;  %v22_v17 = vld [vmem:[%s1482_s1 + $0x38] sm:$0xff]  ;;  %v1225_v21 = vld [vmem:[%s1482_s1 + $0x40] sm:$0xff] }
   0x4   :  { %v1202_v12 = vpack.c.bf16 %v42_v5, %v39_v4  ;;  %v57_v19 = vand.u32 4294901760, %v21_v16  ;;  %v60_v20 = vand.u32 4294901760, %v22_v17  ;;  %v1230_v22 = vld [vmem:[%s1482_s1 + $0x48] sm:$0xff]  ;;  %v63_v24 = vand.u32 4294901760, %v1225_v21  ;;  %v14_v26 = vld [vmem:[%s1483_s0] sm:$0xff]  ;;  %v1246_v27 = vld [vmem:[%s1482_s1 + $0x50] sm:$0xff] }
   0x5   :  { %v1206_v13 = vpack.c.bf16 %v48_v9, %v45_v7  ;;  %v1218_v18 = vpack.c.bf16 %v54_v15, %v51_v14  ;;  %v66_v25 = vand.u32 4294901760, %v1230_v22  ;;  %v1251_v28 = vld [vmem:[%s1482_s1 + $0x58] sm:$0xff]  ;;  %v1253_v29 = vsub.f32 %v15_v1, %v39_v4  ;;  %v1268_v35 = vld [vmem:[%s1482_s1 + $0x60] sm:$0xff]  ;;  %v1275_v36 = vld [vmem:[%s1482_s1 + $0x68] sm:$0xff] }
   0x6   :  { %1000 = vmatpush3.bf16.msra.mxu1 %v1202_v12  ;;  %1072 = vmatpush3.bf16.msra.mxu0 %v1202_v12  ;;  %v1234_v23 = vpack.c.bf16 %v60_v20, %v57_v19  ;;  %v1255_v30 = vand.u32 4294901760, %v14_v26  ;;  %v1257_v31 = vsub.f32 %v16_v2, %v42_v5  ;;  %v69_v33 = vand.u32 4294901760, %v1246_v27  ;;  %v1297_v43 = vld [vmem:[%s1482_s1 + $0x70] sm:$0xff]  ;;  %v1302_v44 = vld [vmem:[%s1482_s1 + $0x78] sm:$0xff] }
   0x7   :  { %1001 = vmatprep.subr.bf16.mxu1 %v1155_v0  ;;  %1073 = vmatprep.subr.bf16.mxu0 %v1155_v0  ;;  %v1261_v32 = vpack.c.bf16 %v66_v25, %v63_v24  ;;  %v72_v34 = vand.u32 4294901760, %v1251_v28  ;;  %v1277_v37 = vsub.f32 %v17_v3, %v45_v7  ;;  %v1279_v38 = vsub.f32 %v18_v6, %v48_v9 }
   0x8   :  { %v75_v39 = vand.u32 4294901760, %v1268_v35  ;;  %v1283_v40 = vsub.f32 %v14_v26, %v1255_v30  ;;  %v78_v42 = vand.u32 4294901760, %v1275_v36  ;;  %v132_v45 = vand.u32 4294901760, %v1253_v29 }
   0x9   :  { %v1291_v41 = vpack.c.bf16 %v72_v34, %v69_v33  ;;  %v139_v46 = vand.u32 4294901760, %v1257_v31  ;;  %v1308_v47 = vsub.f32 %v19_v10, %v51_v14  ;;  %v1310_v48 = vsub.f32 %v20_v11, %v54_v15 }
   0xa   :  { %1003 = vmatpush3.bf16.msra.mxu1 %v1206_v13  ;;  %1075 = vmatpush3.bf16.msra.mxu0 %v1206_v13  ;;  %v81_v49 = vand.u32 4294901760, %v1297_v43  ;;  %v84_v50 = vand.u32 4294901760, %v1302_v44  ;;  %v121_v51 = vand.u32 4294901760, %v1283_v40  ;;  %v146_v52 = vand.u32 4294901760, %v1277_v37 }
   0xb   :  { %1004 = vmatprep.subr.bf16.mxu1 %v1155_v0  ;;  %1076 = vmatprep.subr.bf16.mxu0 %v1155_v0  ;;  %v1322_v53 = vpack.c.bf16 %v78_v42, %v75_v39  ;;  %v133_v54 = vsub.f32 %v1253_v29, %v132_v45  ;;  %v140_v55 = vsub.f32 %v1257_v31, %v139_v46  ;;  %v153_v56 = vand.u32 4294901760, %v1279_v38 }
   0xc   :  { %v1329_v57 = vsub.f32 %v21_v16, %v57_v19  ;;  %v1331_v58 = vsub.f32 %v22_v17, %v60_v20  ;;  %v122_v59 = vsub.f32 %v1283_v40, %v121_v51  ;;  %v147_v60 = vsub.f32 %v1277_v37, %v146_v52 }
   0xd   :  { %v160_v61 = vand.u32 4294901760, %v1308_v47  ;;  %v167_v62 = vand.u32 4294901760, %v1310_v48  ;;  %v1343_v63 = vpack.c.bf16 %v84_v50, %v81_v49  ;;  %v134_v1 = vand.u32 4294901760, %v133_v54 }
   0xe   :  { %1006 = vmatpush3.bf16.msra.mxu1 %v1218_v18  ;;  %1078 = vmatpush3.bf16.msra.mxu0 %v1218_v18  ;;  %v141_v2 = vand.u32 4294901760, %v140_v55  ;;  %v154_v3 = vsub.f32 %v1279_v38, %v153_v56  ;;  %v1349_v4 = vsub.f32 %v1225_v21, %v63_v24  ;;  %v1352_v5 = vsub.f32 %v1230_v22, %v66_v25 }
   0xf   :  { %1007 = vmatprep.subr.bf16.mxu1 %v1155_v0  ;;  %1079 = vmatprep.subr.bf16.mxu0 %v1155_v0  ;;  %v1095_v6 = vpack.c.bf16 %v139_v46, %v132_v45  ;;  %v123_v7 = vand.u32 4294901760, %v122_v59  ;;  %v148_v9 = vand.u32 4294901760, %v147_v60  ;;  %v161_v10 = vsub.f32 %v1308_v47, %v160_v61 }
  0x10   :  { %v168_v11 = vsub.f32 %v1310_v48, %v167_v62  ;;  %v1023_v14 = vpack.c.bf16 %v141_v2, %v134_v1  ;;  %v155_v15 = vand.u32 4294901760, %v154_v3  ;;  %v174_v16 = vand.u32 4294901760, %v1329_v57 }
  0x11   :  { %v181_v17 = vand.u32 4294901760, %v1331_v58  ;;  %v1365_v19 = vsub.f32 %v1246_v27, %v69_v33  ;;  %v1370_v20 = vsub.f32 %v1251_v28, %v72_v34  ;;  %v1098_v21 = vpack.c.bf16 %v153_v56, %v146_v52 }
  0x12   :  { %1009 = vmatpush3.bf16.msra.mxu1 %v1234_v23  ;;  %1081 = vmatpush3.bf16.msra.mxu0 %v1234_v23  ;;  %v162_v22 = vand.u32 4294901760, %v161_v10  ;;  %v169_v24 = vand.u32 4294901760, %v168_v11  ;;  %v188_v25 = vand.u32 4294901760, %v1349_v4  ;;  %v1026_v26 = vpack.c.bf16 %v155_v15, %v148_v9 }
  0x13   :  { %1010 = vmatprep.subr.bf16.mxu1 %v1155_v0  ;;  %1082 = vmatprep.subr.bf16.mxu0 %v1155_v0  ;;  %v175_v45 = vsub.f32 %v1329_v57, %v174_v16  ;;  %v182_v27 = vsub.f32 %v1331_v58, %v181_v17  ;;  %v195_v33 = vand.u32 4294901760, %v1352_v5  ;;  %v1381_v28 = vsub.f32 %v1268_v35, %v75_v39 }
  0x14   :  { %v1386_v34 = vsub.f32 %v1275_v36, %v78_v42  ;;  %v1029_v46 = vpack.c.bf16 %v169_v24, %v162_v22  ;;  %v189_v52 = vsub.f32 %v1349_v4, %v188_v25  ;;  %v202_v54 = vand.u32 4294901760, %v1365_v19 }
  0x15   :  { %v176_v35 = vand.u32 4294901760, %v175_v45  ;;  %v183_v39 = vand.u32 4294901760, %v182_v27  ;;  %v196_v55 = vsub.f32 %v1352_v5, %v195_v33  ;;  %v209_v36 = vand.u32 4294901760, %v1370_v20 }
  0x16   :  { %1012 = vmatpush3.bf16.msra.mxu1 %v1261_v32  ;;  %1084 = vmatpush3.bf16.msra.mxu0 %v1261_v32  ;;  %v1401_v42 = vsub.f32 %v1297_v43, %v81_v49  ;;  %v1406_v56 = vsub.f32 %v1302_v44, %v84_v50  ;;  %v1104_v59 = vpack.c.bf16 %v181_v17, %v174_v16  ;;  %v190_v60 = vand.u32 4294901760, %v189_v52 }
  0x17   :  { %1013 = vmatprep.subr.bf16.mxu1 %v1155_v0  ;;  %1085 = vmatprep.subr.bf16.mxu0 %v1155_v0  ;;  %v1032_v1 = vpack.c.bf16 %v183_v39, %v176_v35  ;;  %v197_v2 = vand.u32 4294901760, %v196_v55  ;;  %v210_v3 = vsub.f32 %v1370_v20, %v209_v36  ;;  %v223_v43 = vand.u32 4294901760, %v1386_v34 }
  0x18   :  { %v1107_v44 = vpack.c.bf16 %v195_v33, %v188_v25  ;;  %v237_v11 = vand.u32 4294901760, %v1406_v56 }
  0x19   :  { %v211_v9 = vand.u32 4294901760, %v210_v3  ;;  %v224_v10 = vsub.f32 %v1386_v34, %v223_v43 }
  0x1a   :  { %1015 = vmatpush3.bf16.msra.mxu1 %v1291_v41  ;;  %1087 = vmatpush3.bf16.msra.mxu0 %v1291_v41  ;;  %v238_v22 = vsub.f32 %v1406_v56, %v237_v11 }
  0x1b   :  { %1016 = vmatprep.subr.bf16.mxu1 %v1155_v0  ;;  %1088 = vmatprep.subr.bf16.mxu0 %v1155_v0  ;;  %v225_v17 = vand.u32 4294901760, %v224_v10 }
  0x1c   :  { %v239_v45 = vand.u32 4294901760, %v238_v22 }
  0x1e   :  { %1018 = vmatpush3.bf16.msra.mxu1 %v1322_v53  ;;  %1090 = vmatpush3.bf16.msra.mxu0 %v1322_v53 }
  0x1f   :  { %1019 = vmatprep.subr.bf16.mxu1 %v1155_v0  ;;  %1091 = vmatprep.subr.bf16.mxu0 %v1155_v0 }
  0x22   :  { %1021 = vmatpush3.bf16.msra.mxu1 %v1343_v63  ;;  %1093 = vmatpush3.bf16.msra.mxu0 %v1343_v63 }
  0x23   :  { %1022 = vmatprep.subr.bf16.mxu1 %v1155_v0  ;;  %1094 = vmatprep.subr.bf16.mxu0 %v1155_v0 }
  0x25   :  { %821 = vmatmul.mubr.f32.vlgmr.msra.gmra.mrb[0].mxu1 %v123_v7  ;;  %926 = vmatmul.mubr.f32.vlgmr.msra.gmra.mrb[0].mxu0 %v121_v51  ;;  %v1101_v51 = vpack.c.bf16 %v167_v62, %v160_v61  ;;  %v203_v61 = vsub.f32 %v1365_v19, %v202_v54  ;;  %v216_v62 = vand.u32 4294901760, %v1381_v28  ;;  %v1035_v7 = vpack.c.bf16 %v197_v2, %v190_v60 }
  0x26   :  { %1024 = vmatpush3.bf16.msra.mxu1 %v1023_v14  ;;  %1096 = vmatpush3.bf16.msra.mxu0 %v1095_v6  ;;  %v230_v6 = vand.u32 4294901760, %v1401_v42  ;;  %v1110_v14 = vpack.c.bf16 %v209_v36, %v202_v54 }
  0x27   :  { %1025 = vmatprep.subr.bf16.mxu1 %v1155_v0  ;;  %1097 = vmatprep.subr.bf16.mxu0 %v1155_v0  ;;  %v204_v49 = vand.u32 4294901760, %v203_v61  ;;  %v217_v50 = vsub.f32 %v1381_v28, %v216_v62  ;;  %v1113_v25 = vpack.c.bf16 %v223_v43, %v216_v62 }
  0x28   :  { %855 = vmatprep.mubr.msk.f32.mxu1 %vm1156_vm0, %v1157_v8  ;;  %960 = vmatprep.mubr.msk.f32.mxu0 %vm1156_vm0, %v1157_v8  ;;  %v1116_v33 = vpack.c.bf16 %v237_v11, %v230_v6 }
  0x29   :  { %v218_v15 = vand.u32 4294901760, %v217_v50  ;;  %v1038_v16 = vpack.c.bf16 %v211_v9, %v204_v49 }
  0x2a   :  { %1027 = vmatpush3.bf16.msra.mxu1 %v1026_v26  ;;  %1099 = vmatpush3.bf16.msra.mxu0 %v1098_v21  ;;  %v231_v21 = vsub.f32 %v1401_v42, %v230_v6 }
  0x2b   :  { %1028 = vmatprep.subr.bf16.mxu1 %v1155_v0  ;;  %1100 = vmatprep.subr.bf16.mxu0 %v1155_v0  ;;  %v1041_v24 = vpack.c.bf16 %v225_v17, %v218_v15 }
  0x2c   :  { %v232_v26 = vand.u32 4294901760, %v231_v21 }
  0x2e   :  { %1030 = vmatpush3.bf16.msra.mxu1 %v1029_v46  ;;  %1102 = vmatpush3.bf16.msra.mxu0 %v1101_v51  ;;  %v1044_v27 = vpack.c.bf16 %v239_v45, %v232_v26  ;;  %v1047_v46 = vpack.c.bf16 %v1257_v31, %v1253_v29  ;;  %v1050_v51 = vpack.c.bf16 %v1279_v38, %v1277_v37  ;;  %v685_v31 = vld [vmem:[%s1484_s2] ss:$0 sm:$0xff] }
  0x2f   :  { %1031 = vmatprep.subr.bf16.mxu1 %v1155_v0  ;;  %1103 = vmatprep.subr.bf16.mxu0 %v1155_v0  ;;  %v1053_v29 = vpack.c.bf16 %v1310_v48, %v1308_v47 }
  0x32   :  { %1033 = vmatpush3.bf16.msra.mxu1 %v1032_v1  ;;  %1105 = vmatpush3.bf16.msra.mxu0 %v1104_v59 }
  0x33   :  { %1034 = vmatprep.subr.bf16.mxu1 %v1155_v0  ;;  %1106 = vmatprep.subr.bf16.mxu0 %v1155_v0 }
  0x36   :  { %1036 = vmatpush3.bf16.msra.mxu1 %v1035_v7  ;;  %1108 = vmatpush3.bf16.msra.mxu0 %v1107_v44 }
  0x37   :  { %1037 = vmatprep.subr.bf16.mxu1 %v1155_v0  ;;  %1109 = vmatprep.subr.bf16.mxu0 %v1155_v0 }
  0x3a   :  { %1039 = vmatpush3.bf16.msra.mxu1 %v1038_v16  ;;  %1111 = vmatpush3.bf16.msra.mxu0 %v1110_v14 }
  0x3b   :  { %1040 = vmatprep.subr.bf16.mxu1 %v1155_v0  ;;  %1112 = vmatprep.subr.bf16.mxu0 %v1155_v0 }
  0x3e   :  { %1042 = vmatpush3.bf16.msra.mxu1 %v1041_v24  ;;  %1114 = vmatpush3.bf16.msra.mxu0 %v1113_v25 }
  0x3f   :  { %1043 = vmatprep.subr.bf16.mxu1 %v1155_v0  ;;  %1115 = vmatprep.subr.bf16.mxu0 %v1155_v0 }
  0x42   :  { %1045 = vmatpush3.bf16.msra.mxu1 %v1044_v27  ;;  %1117 = vmatpush3.bf16.msra.mxu0 %v1116_v33 }
  0x43   :  { %1046 = vmatprep.subr.bf16.mxu1 %v1155_v0  ;;  %1118 = vmatprep.subr.bf16.mxu0 %v1155_v0 }
  0x45   :  { %856 = vmatmul.mubr.f32.vlgmr.msra.gmra.mrb[0].mxu1 %v1255_v30  ;;  %961 = vmatmul.mubr.f32.vlgmr.msra.gmra.mrb[0].mxu0 %v1255_v30 }
  0x46   :  { %1048 = vmatpush3.bf16.msra.mxu1 %v1047_v46  ;;  %1120 = vmatpush3.bf16.msra.mxu0 %v1202_v12  ;;  %v1056_v12 = vpack.c.bf16 %v1331_v58, %v1329_v57 }
  0x47   :  { %1049 = vmatprep.subr.bf16.mxu1 %v1155_v0  ;;  %1121 = vmatprep.subr.bf16.mxu0 %v1155_v0 }
  0x48   :  { %890 = vmatprep.mubr.msk.f32.mxu1 %vm1156_vm0, %v1157_v8  ;;  %995 = vmatprep.mubr.msk.f32.mxu0 %vm1156_vm0, %v1157_v8  ;;  %v1059_v8 = vpack.c.bf16 %v1352_v5, %v1349_v4 }
  0x4a   :  { %1051 = vmatpush3.bf16.msra.mxu1 %v1050_v51  ;;  %1123 = vmatpush3.bf16.msra.mxu0 %v1206_v13  ;;  %v1062_v13 = vpack.c.bf16 %v1370_v20, %v1365_v19 }
  0x4b   :  { %1052 = vmatprep.subr.bf16.mxu1 %v1155_v0  ;;  %1124 = vmatprep.subr.bf16.mxu0 %v1155_v0 }
  0x4e   :  { %1054 = vmatpush3.bf16.msra.mxu1 %v1053_v29  ;;  %1126 = vmatpush3.bf16.msra.mxu0 %v1218_v18  ;;  %v1065_v18 = vpack.c.bf16 %v1386_v34, %v1381_v28 }
  0x4f   :  { %1055 = vmatprep.subr.bf16.mxu1 %v1155_v0  ;;  %1127 = vmatprep.subr.bf16.mxu0 %v1155_v0 }
  0x52   :  { %1057 = vmatpush3.bf16.msra.mxu1 %v1056_v12  ;;  %1129 = vmatpush3.bf16.msra.mxu0 %v1234_v23  ;;  %v1068_v23 = vpack.c.bf16 %v1406_v56, %v1401_v42 }
  0x53   :  { %1058 = vmatprep.subr.bf16.mxu1 %v1155_v0  ;;  %1130 = vmatprep.subr.bf16.mxu0 %v1155_v0 }
  0x56   :  { %1060 = vmatpush3.bf16.msra.mxu1 %v1059_v8  ;;  %1132 = vmatpush3.bf16.msra.mxu0 %v1261_v32 }
  0x57   :  { %1061 = vmatprep.subr.bf16.mxu1 %v1155_v0  ;;  %1133 = vmatprep.subr.bf16.mxu0 %v1155_v0 }
  0x5a   :  { %1063 = vmatpush3.bf16.msra.mxu1 %v1062_v13  ;;  %1135 = vmatpush3.bf16.msra.mxu0 %v1291_v41 }
  0x5b   :  { %1064 = vmatprep.subr.bf16.mxu1 %v1155_v0  ;;  %1136 = vmatprep.subr.bf16.mxu0 %v1155_v0 }
  0x5e   :  { %1066 = vmatpush3.bf16.msra.mxu1 %v1065_v18  ;;  %1138 = vmatpush3.bf16.msra.mxu0 %v1322_v53 }
  0x5f   :  { %1067 = vmatprep.subr.bf16.mxu1 %v1155_v0  ;;  %1139 = vmatprep.subr.bf16.mxu0 %v1155_v0 }
  0x62   :  { %1069 = vmatpush3.bf16.msra.mxu1 %v1068_v23  ;;  %1141 = vmatpush3.bf16.msra.mxu0 %v1343_v63 }
  0x65   :  { %891 = vmatmul.mubr.f32.vlgmr.msra.gmra.mrb[0].mxu1 %v1283_v40  ;;  %996 = vmatmul.mubr.f32.vlgmr.msra.gmra.mrb[0].mxu0 %v1255_v30 }
 0x138   :  { %v380_v32 = vpop.f32.mrb[0].mxu1  ;;  %v675_v37 = vpop.f32.mrb[0].mxu0 }
 0x139   :  { %v1142_v38 = vadd.f32 %v685_v31, %v380_v32  ;;  %v892_v41 = vpop.f32.mrb[1].mxu1  ;;  %v997_v47 = vpop.f32.mrb[1].mxu0 }
 0x13b   :  { %v1143_v48 = vadd.f32 %v1142_v38, %v675_v37 }
 0x13d   :  { %680 = vst.msk [vmem:[%s1485_s3] sm:$0xff] %vm679_vm1, %v1143_v48 }

</bundles_post_ra>
